<compile_context>
chip_gen: v5e
topology: v5e:2x2
jax: 0.10.0
libtpu: 0.0.40
codegen_flags: <defaults>
</compile_context>

<pallas_src>
import jax
import jax.numpy as jnp
from jax.experimental import pallas as pl
from jax.experimental.pallas import tpu as pltpu


W4_PAD = 128  # fc4 matmul runs N-padded to 128 on the MXU; store is sliced to 2


def mlp_kernel(x_ref, w1_ref, b1_ref, w2_ref, b2_ref,
               w3_ref, b3_ref, w4_ref, b4_ref, o_ref):
    # 4 MXU matmuls (bf16 inputs, f32 accumulation) + f32 bias/ReLU on the VPU.
    x = x_ref[...].astype(jnp.bfloat16)

    h = jnp.dot(x, w1_ref[...], preferred_element_type=jnp.float32)
    h = jnp.maximum(h + b1_ref[...], 0.0)
    # TODO(synk): nn.Dropout(0.2) skipped (inference semantics / identity).

    h = jnp.dot(h.astype(jnp.bfloat16), w2_ref[...],
                preferred_element_type=jnp.float32)
    h = jnp.maximum(h + b2_ref[...], 0.0)

    h = jnp.dot(h.astype(jnp.bfloat16), w3_ref[...],
                preferred_element_type=jnp.float32)
    h = jnp.maximum(h + b3_ref[...], 0.0)

    h = jnp.dot(h.astype(jnp.bfloat16), w4_ref[...],
                preferred_element_type=jnp.float32)
    h = h + b4_ref[...]
    # Narrow store: only the real output columns go to HBM (masked 2-lane vst,
    # negligible vs 4 matmuls; cuts output HBM traffic / VMEM buffers 64x).
    n_out = o_ref.shape[-1]
    o_ref[...] = h[:, :n_out].astype(o_ref.dtype)


def _round_up(n, m):
    return ((n + m - 1) // m) * m


def mlp_forward(x, params, *, batch_tile=2048):
    """x: [B, 20] float32. params: dict of (w, b) per layer, w is [in, out]."""
    B, D_in = x.shape
    assert D_in == 20
    w1, b1 = params["fc1"]
    w2, b2 = params["fc2"]
    w3, b3 = params["fc3"]
    w4, b4 = params["fc4"]
    D_out = w4.shape[1]  # 2

    # fc4 matmul stays MXU-friendly: zero-pad its output dim to 128 in-kernel.
    w4p = jnp.zeros((w4.shape[0], W4_PAD), w4.dtype).at[:, :D_out].set(w4)
    b4p = jnp.zeros((W4_PAD,), b4.dtype).at[:D_out].set(b4)

    # bf16 weights for the MXU; f32 biases (kept 2D for TPU-friendly layouts).
    w1b, w2b = w1.astype(jnp.bfloat16), w2.astype(jnp.bfloat16)
    w3b, w4b = w3.astype(jnp.bfloat16), w4p.astype(jnp.bfloat16)
    b1r, b2r = b1.reshape(1, -1), b2.reshape(1, -1)
    b3r, b4r = b3.reshape(1, -1), b4p.reshape(1, -1)

    # Tile selection:
    #  * big tiles (default 2048) amortize the ~0.35 us/step overhead and the
    #    per-step RHS re-push into the MXU; 2048 keeps VMEM well inside the
    #    32 MiB scoped default on every generation (incl. v7x's 64 MiB VMEM).
    #  * cap the tile at ~B/2 so the grid has >= 2 steps whenever possible and
    #    v7x's two TensorCores both get work on the "parallel" axis.
    batch_tile = _round_up(max(batch_tile, 8), 8)
    half = _round_up(max(pl.cdiv(B, 2), 1), 8)
    tile = max(min(batch_tile, half), 8)
    grid = (pl.cdiv(B, tile),)  # ragged tail handled by masked writeback

    # Weights/biases are small; each grid step sees the full parameter block.
    def full(arr):
        return pl.BlockSpec(arr.shape, lambda i: (0, 0))

    out = pl.pallas_call(
        mlp_kernel,
        out_shape=jax.ShapeDtypeStruct((B, D_out), x.dtype),
        grid_spec=pltpu.PrefetchScalarGridSpec(
            num_scalar_prefetch=0,
            grid=grid,
            in_specs=[
                pl.BlockSpec((tile, D_in), lambda i: (i, 0)),  # x tile
                full(w1b), full(b1r),
                full(w2b), full(b2r),
                full(w3b), full(b3r),
                full(w4b), full(b4r),
            ],
            out_specs=pl.BlockSpec((tile, D_out), lambda i: (i, 0)),
        ),
        compiler_params=pltpu.CompilerParams(
            dimension_semantics=("parallel",)),
    )(x, w1b, b1r, w2b, b2r, w3b, b3r, w4b, b4r)

    return out


def init_params(key):
    """Deterministic init matching nn.Linear shapes (stored as [in, out])."""
    dims = [(20, 128), (128, 256), (256, 128), (128, 2)]
    names = ["fc1", "fc2", "fc3", "fc4"]
    params = {}
    for name, (d_in, d_out) in zip(names, dims):
        key, kw, kb = jax.random.split(key, 3)
        bound = 1.0 / jnp.sqrt(d_in)
        w = jax.random.uniform(kw, (d_in, d_out), jnp.float32, -bound, bound)
        b = jax.random.uniform(kb, (d_out,), jnp.float32, -bound, bound)
        params[name] = (w, b)
    return params


def mlp_reference(x, params):
    """Mirrors the kernel's numerics: bf16 MXU inputs, f32 accumulation."""
    h = x
    for name in ["fc1", "fc2", "fc3"]:
        w, b = params[name]
        h = jnp.dot(h.astype(jnp.bfloat16), w.astype(jnp.bfloat16),
                    preferred_element_type=jnp.float32)
        h = jnp.maximum(h + b, 0.0)
    w, b = params["fc4"]
    return jnp.dot(h.astype(jnp.bfloat16), w.astype(jnp.bfloat16),
                   preferred_element_type=jnp.float32) + b


if __name__ == "__main__":
    key = jax.random.PRNGKey(0)
    key, kx1, kx2 = jax.random.split(key, 3)
    params = init_params(key)

    # Small case (single grid step, tiny tile).
    batch = 8
    x = jax.random.normal(kx1, (batch, 20), jnp.float32)
    out = jax.block_until_ready(mlp_forward(x, params))
    ref = mlp_reference(x, params)
    assert out.shape == (batch, 2), out.shape
    assert jnp.allclose(out, ref, atol=2e-2, rtol=2e-2), "mismatch (small batch)"

    # Larger case: multi-step grid + ragged final block (1000 % 256 != 0),
    # exercising the no-pad masked-writeback path.
    batch2 = 1000
    x2 = jax.random.normal(kx2, (batch2, 20), jnp.float32)
    out2 = jax.block_until_ready(mlp_forward(x2, params, batch_tile=256))
    ref2 = mlp_reference(x2, params)
    assert out2.shape == (batch2, 2), out2.shape
    assert jnp.allclose(out2, ref2, atol=2e-2, rtol=2e-2), "mismatch (tiled batch)"

    print("KERNEL_OK")
</pallas_src>

<mosaic_0001>
module attributes {stable_mosaic.version = 11 : i64} {
  func.func @mlp_kernel(%arg0: i32, %arg1: memref<8x20xf32, #tpu.memory_space<vmem>>, %arg2: memref<20x128xbf16, #tpu.memory_space<vmem>>, %arg3: memref<1x128xf32, #tpu.memory_space<vmem>>, %arg4: memref<128x256xbf16, #tpu.memory_space<vmem>>, %arg5: memref<1x256xf32, #tpu.memory_space<vmem>>, %arg6: memref<256x128xbf16, #tpu.memory_space<vmem>>, %arg7: memref<1x128xf32, #tpu.memory_space<vmem>>, %arg8: memref<128x128xbf16, #tpu.memory_space<vmem>>, %arg9: memref<1x128xf32, #tpu.memory_space<vmem>>, %arg10: memref<8x2xf32, #tpu.memory_space<vmem>>) attributes {dimension_semantics = [#tpu.dimension_semantics<parallel>], iteration_bounds = array<i64: 1>, scalar_prefetch = 0 : i64, scratch_operands = 0 : i64, tpu.core_type = #tpu.core_type<tc>, window_params = [{transform_indices = @transform_0, window_bounds = array<i64: 8, 20>}, {pipeline_mode = #tpu.pipeline_mode<synchronous>, transform_indices = @transform_1, window_bounds = array<i64: 20, 128>}, {pipeline_mode = #tpu.pipeline_mode<synchronous>, transform_indices = @transform_2, window_bounds = array<i64: 1, 128>}, {pipeline_mode = #tpu.pipeline_mode<synchronous>, transform_indices = @transform_3, window_bounds = array<i64: 128, 256>}, {pipeline_mode = #tpu.pipeline_mode<synchronous>, transform_indices = @transform_4, window_bounds = array<i64: 1, 256>}, {pipeline_mode = #tpu.pipeline_mode<synchronous>, transform_indices = @transform_5, window_bounds = array<i64: 256, 128>}, {pipeline_mode = #tpu.pipeline_mode<synchronous>, transform_indices = @transform_6, window_bounds = array<i64: 1, 128>}, {pipeline_mode = #tpu.pipeline_mode<synchronous>, transform_indices = @transform_7, window_bounds = array<i64: 128, 128>}, {pipeline_mode = #tpu.pipeline_mode<synchronous>, transform_indices = @transform_8, window_bounds = array<i64: 1, 128>}, {transform_indices = @transform_9, window_bounds = array<i64: 8, 2>}]} {
    %c0 = arith.constant 0 : index
    %c0_0 = arith.constant 0 : index
    %0 = vector.load %arg1[%c0, %c0_0] : memref<8x20xf32, #tpu.memory_space<vmem>>, vector<8x20xf32>
    %1 = arith.truncf %0 : vector<8x20xf32> to vector<8x20xbf16>
    %c0_1 = arith.constant 0 : index
    %c0_2 = arith.constant 0 : index
    %2 = vector.load %arg2[%c0_1, %c0_2] : memref<20x128xbf16, #tpu.memory_space<vmem>>, vector<20x128xbf16>
    %cst = arith.constant dense<0.000000e+00> : vector<8x128xf32>
    %3 = tpu.matmul %1, %2, %cst {dimension_numbers = #tpu.dot_dimension_numbers<[1], [0], [0], [1], [0, 0, 1, 1], [], []>} : vector<8x20xbf16>, vector<20x128xbf16>, vector<8x128xf32> -> vector<8x128xf32>
    %c0_3 = arith.constant 0 : index
    %c0_4 = arith.constant 0 : index
    %4 = vector.load %arg3[%c0_3, %c0_4] : memref<1x128xf32, #tpu.memory_space<vmem>>, vector<1x128xf32>
    %5 = vector.broadcast %4 : vector<1x128xf32> to vector<8x128xf32>
    %6 = arith.addf %3, %5 : vector<8x128xf32>
    %cst_5 = arith.constant 0.000000e+00 : f32
    %7 = vector.broadcast %cst_5 : f32 to vector<8x128xf32>
    %8 = arith.maximumf %6, %7 : vector<8x128xf32>
    %9 = arith.truncf %8 : vector<8x128xf32> to vector<8x128xbf16>
    %c0_6 = arith.constant 0 : index
    %c0_7 = arith.constant 0 : index
    %10 = vector.load %arg4[%c0_6, %c0_7] : memref<128x256xbf16, #tpu.memory_space<vmem>>, vector<128x256xbf16>
    %cst_8 = arith.constant dense<0.000000e+00> : vector<8x256xf32>
    %11 = tpu.matmul %9, %10, %cst_8 {dimension_numbers = #tpu.dot_dimension_numbers<[1], [0], [0], [1], [0, 0, 1, 1], [], []>} : vector<8x128xbf16>, vector<128x256xbf16>, vector<8x256xf32> -> vector<8x256xf32>
    %c0_9 = arith.constant 0 : index
    %c0_10 = arith.constant 0 : index
    %12 = vector.load %arg5[%c0_9, %c0_10] : memref<1x256xf32, #tpu.memory_space<vmem>>, vector<1x256xf32>
    %13 = vector.broadcast %12 : vector<1x256xf32> to vector<8x256xf32>
    %14 = arith.addf %11, %13 : vector<8x256xf32>
    %cst_11 = arith.constant 0.000000e+00 : f32
    %15 = vector.broadcast %cst_11 : f32 to vector<8x256xf32>
    %16 = arith.maximumf %14, %15 : vector<8x256xf32>
    %17 = arith.truncf %16 : vector<8x256xf32> to vector<8x256xbf16>
    %c0_12 = arith.constant 0 : index
    %c0_13 = arith.constant 0 : index
    %18 = vector.load %arg6[%c0_12, %c0_13] : memref<256x128xbf16, #tpu.memory_space<vmem>>, vector<256x128xbf16>
    %cst_14 = arith.constant dense<0.000000e+00> : vector<8x128xf32>
    %19 = tpu.matmul %17, %18, %cst_14 {dimension_numbers = #tpu.dot_dimension_numbers<[1], [0], [0], [1], [0, 0, 1, 1], [], []>} : vector<8x256xbf16>, vector<256x128xbf16>, vector<8x128xf32> -> vector<8x128xf32>
    %c0_15 = arith.constant 0 : index
    %c0_16 = arith.constant 0 : index
    %20 = vector.load %arg7[%c0_15, %c0_16] : memref<1x128xf32, #tpu.memory_space<vmem>>, vector<1x128xf32>
    %21 = vector.broadcast %20 : vector<1x128xf32> to vector<8x128xf32>
    %22 = arith.addf %19, %21 : vector<8x128xf32>
    %cst_17 = arith.constant 0.000000e+00 : f32
    %23 = vector.broadcast %cst_17 : f32 to vector<8x128xf32>
    %24 = arith.maximumf %22, %23 : vector<8x128xf32>
    %25 = arith.truncf %24 : vector<8x128xf32> to vector<8x128xbf16>
    %c0_18 = arith.constant 0 : index
    %c0_19 = arith.constant 0 : index
    %26 = vector.load %arg8[%c0_18, %c0_19] : memref<128x128xbf16, #tpu.memory_space<vmem>>, vector<128x128xbf16>
    %cst_20 = arith.constant dense<0.000000e+00> : vector<8x128xf32>
    %27 = tpu.matmul %25, %26, %cst_20 {dimension_numbers = #tpu.dot_dimension_numbers<[1], [0], [0], [1], [0, 0, 1, 1], [], []>} : vector<8x128xbf16>, vector<128x128xbf16>, vector<8x128xf32> -> vector<8x128xf32>
    %c0_21 = arith.constant 0 : index
    %c0_22 = arith.constant 0 : index
    %28 = vector.load %arg9[%c0_21, %c0_22] : memref<1x128xf32, #tpu.memory_space<vmem>>, vector<1x128xf32>
    %29 = vector.broadcast %28 : vector<1x128xf32> to vector<8x128xf32>
    %30 = arith.addf %27, %29 : vector<8x128xf32>
    %31 = vector.extract_strided_slice %30 {offsets = [0, 0], sizes = [8, 2], strides = [1, 1]} : vector<8x128xf32> to vector<8x2xf32>
    %c0_23 = arith.constant 0 : index
    %c0_24 = arith.constant 0 : index
    %32 = vector.load %arg10[%c0_23, %c0_24] : memref<8x2xf32, #tpu.memory_space<vmem>>, vector<8x2xf32>
    tpu.vector_store %arg10[%c0_23, %c0_24], %31 {strides = array<i32>} : memref<8x2xf32, #tpu.memory_space<vmem>>, vector<8x2xf32>,
    return
  }
  func.func @transform_0(%arg0: i32) -> (i32, i32) {
    %c0_i32 = arith.constant 0 : i32
    %c0_i32_0 = arith.constant 0 : i32
    return %arg0, %c0_i32 : i32, i32
  }
  func.func @transform_1(%arg0: i32) -> (i32, i32) {
    %c0_i32 = arith.constant 0 : i32
    %c0_i32_0 = arith.constant 0 : i32
    %c0_i32_1 = arith.constant 0 : i32
    return %c0_i32, %c0_i32_0 : i32, i32
  }
  func.func @transform_2(%arg0: i32) -> (i32, i32) {
    %c0_i32 = arith.constant 0 : i32
    %c0_i32_0 = arith.constant 0 : i32
    %c0_i32_1 = arith.constant 0 : i32
    return %c0_i32, %c0_i32_0 : i32, i32
  }
  func.func @transform_3(%arg0: i32) -> (i32, i32) {
    %c0_i32 = arith.constant 0 : i32
    %c0_i32_0 = arith.constant 0 : i32
    %c0_i32_1 = arith.constant 0 : i32
    return %c0_i32, %c0_i32_0 : i32, i32
  }
  func.func @transform_4(%arg0: i32) -> (i32, i32) {
    %c0_i32 = arith.constant 0 : i32
    %c0_i32_0 = arith.constant 0 : i32
    %c0_i32_1 = arith.constant 0 : i32
    return %c0_i32, %c0_i32_0 : i32, i32
  }
  func.func @transform_5(%arg0: i32) -> (i32, i32) {
    %c0_i32 = arith.constant 0 : i32
    %c0_i32_0 = arith.constant 0 : i32
    %c0_i32_1 = arith.constant 0 : i32
    return %c0_i32, %c0_i32_0 : i32, i32
  }
  func.func @transform_6(%arg0: i32) -> (i32, i32) {
    %c0_i32 = arith.constant 0 : i32
    %c0_i32_0 = arith.constant 0 : i32
    %c0_i32_1 = arith.constant 0 : i32
    return %c0_i32, %c0_i32_0 : i32, i32
  }
  func.func @transform_7(%arg0: i32) -> (i32, i32) {
    %c0_i32 = arith.constant 0 : i32
    %c0_i32_0 = arith.constant 0 : i32
    %c0_i32_1 = arith.constant 0 : i32
    return %c0_i32, %c0_i32_0 : i32, i32
  }
  func.func @transform_8(%arg0: i32) -> (i32, i32) {
    %c0_i32 = arith.constant 0 : i32
    %c0_i32_0 = arith.constant 0 : i32
    %c0_i32_1 = arith.constant 0 : i32
    return %c0_i32, %c0_i32_0 : i32, i32
  }
  func.func @transform_9(%arg0: i32) -> (i32, i32) {
    %c0_i32 = arith.constant 0 : i32
    %c0_i32_0 = arith.constant 0 : i32
    return %arg0, %c0_i32 : i32, i32
  }
}

</mosaic_0001>

<bundles_post_ra>
// kernel: tpu_custom_call.1
= control target key start
LH: loop header
LB: loop body
LE: loop exit
PB: predicated region body
PF: predicated region fallthrough
CT: control target
= control target key end

     0   :  { %14 = vsyncpa [#allocation3], 0  ;;  %s974_s0 = inlined_call_operand.hbm [shape: f32[8,20], index: 0, kind: input, shape index: {}]   ;;  %s975_s1 = inlined_call_operand.hbm [shape: bf16[20,128], index: 1, kind: input, shape index: {}]   ;;  %s976_s2 = inlined_call_operand.vmem [shape: f32[1,128], index: 2, kind: input, shape index: {}]   ;;  %s977_s3 = inlined_call_operand.hbm [shape: bf16[128,256], index: 3, kind: input, shape index: {}]   ;;  %s978_s4 = inlined_call_operand.vmem [shape: f32[1,256], index: 4, kind: input, shape index: {}]   ;;  %s979_s5 = inlined_call_operand.hbm [shape: bf16[256,128], index: 5, kind: input, shape index: {}]   ;;  %s980_s6 = inlined_call_operand.vmem [shape: f32[1,128], index: 6, kind: input, shape index: {}]   ;;  %s981_s7 = inlined_call_operand.hbm [shape: bf16[128,128], index: 7, kind: input, shape index: {}]   ;;  %s982_s8 = inlined_call_operand.vmem [shape: f32[1,128], index: 8, kind: input, shape index: {}]   ;;  %s983_s9 = inlined_call_operand.vmem [shape: f32[8,2], index: 9, kind: output, shape index: {}]  }
   0x1   :  { %15 = vsyncpa [#allocation5], 0  ;;  %s32_s11 = sshll.u32 %s975_s1, 4  ;;  %s33_s11 = int_to_ptr.hbm [resolvable:$true] %s32_s11 }
   0x2   :  { %16 = vsyncpa [#allocation8], 0  ;;  %s876_s12 = smov [#allocation4]   ;;  %s62_s16 = sshll.u32 %s979_s5, 4  ;;  %s63_s16 = int_to_ptr.hbm [resolvable:$true] %s62_s16 }
   0x3   :  { %s34_s13 = sshll.u32 %s876_s12, 4  ;;  %s877_s17 = smov 64   ;;  %s35_s13 = int_to_ptr.vmem [resolvable:$true] %s34_s13 }
   0x4   :  { %s878_s18 = smov 4   ;;  %s879_s19 = smov [#allocation7]  }
   0x5   :  { %40 = dma.hbm_to_vmem [thread:$0]  %s33_s11, 192, %s35_s13, [#allocation5], %s877_s17, %s877_s17, %s878_s18  }
   0x6   :  { %s64_s20 = sshll.u32 %s879_s19, 4  ;;  %s22_s22 = sshll.u32 %s974_s0, 4  ;;  %s65_s20 = int_to_ptr.vmem [resolvable:$true] %s64_s20  ;;  %s23_s22 = int_to_ptr.hbm [resolvable:$true] %s22_s22 }
   0x7   :  { %70 = dma.hbm_to_vmem [thread:$0]  %s63_s16, 2048, %s65_s20, [#allocation8], %s877_s17, %s877_s17, %s878_s18  }
   0x8   :  { %s47_s24 = sshll.u32 %s977_s3, 4  ;;  %s880_s25 = smov [#allocation2]   ;;  %s48_s24 = int_to_ptr.hbm [resolvable:$true] %s47_s24 }
   0x9   :  { %s24_s26 = sshll.u32 %s880_s25, 4  ;;  %s881_s27 = smov [#allocation6]   ;;  %s25_s26 = int_to_ptr.vmem [resolvable:$true] %s24_s26 }
   0xa   :  { %27 = dma.hbm_to_vmem [thread:$0]  %s23_s22, 128, %s25_s26, [#allocation3]  }
   0xb   :  { %s49_s28 = sshll.u32 %s881_s27, 4  ;;  %s882_s29 = smov 128   ;;  %s50_s28 = int_to_ptr.vmem [resolvable:$true] %s49_s28 }
   0xc   :  { %s883_s0 = smov 8   ;;  %s77_s11 = sshll.u32 %s981_s7, 4  ;;  %s78_s11 = int_to_ptr.hbm [resolvable:$true] %s77_s11 }
   0xd   :  { %55 = dma.hbm_to_vmem [thread:$0]  %s48_s24, 2048, %s50_s28, [#allocation5], %s882_s29, %s882_s29, %s883_s0  }
   0xe   :  { %s884_s12 = smov [#allocation9]  }
   0xf   :  { %s79_s13 = sshll.u32 %s884_s12, 4  ;;  %s80_s13 = int_to_ptr.vmem [resolvable:$true] %s79_s13 }
  0x10   :  { %85 = dma.hbm_to_vmem [thread:$0]  %s78_s11, 1024, %s80_s13, [#allocation8], %s877_s17, %s877_s17, %s878_s18  }
  0x11   :  { %870 = dma.done.wait [#allocation3], 128  }
  0x12   :  { %871 = vsyncadd [#allocation3], 4294967168 }
  0x13   :  { %872 = dma.done.wait [#allocation5], 2240  }
  0x14   :  { %873 = vsyncadd [#allocation5], 4294965056 }
  0x15   :  { %874 = dma.done.wait [#allocation8], 3072  }
  0x16   :  { %875 = vsyncadd [#allocation8], 4294964224  ;;  %v113_v0 = vld [vmem:[#allocation4 + $0x8] sm:$0x3]  ;;  %vm131_vm0 = vcmask 1041408   ;;  %v697_v15 = vld [vmem:[#allocation4] sm:$0xff] }
  0x17   :  { %v123_v1 = vunpack.c.l.b16 %v113_v0  ;;  %v595_v2 = vld [vmem:[#allocation6 + $0x70] sm:$0xf]  ;;  %v713_v3 = vld [vmem:[#allocation6 + $0x74] sm:$0xf0]  ;;  %v712_v4 = vld [vmem:[#allocation6 + $0x74] sm:$0xf] }
  0x18   :  { %v596_v5 = vor.u32 %v713_v3, %v595_v2  ;;  %v597_v6 = vld [vmem:[#allocation6 + $0x78] sm:$0xf0]  ;;  %v587_v7 = vld [vmem:[#allocation6 + $0x60] sm:$0xf]  ;;  %v711_v8 = vld [vmem:[#allocation6 + $0x64] sm:$0xf0] }
  0x19   :  { %v125_v9 = vpack.c.b16 %v123_v1, %v123_v1  ;;  %v600_v10 = vor.u32 %v712_v4, %v597_v6  ;;  %v710_v11 = vld [vmem:[#allocation6 + $0x64] sm:$0xf]  ;;  %v589_v12 = vld [vmem:[#allocation6 + $0x68] sm:$0xf0]  ;;  %v588_v13 = vor.u32 %v711_v8, %v587_v7  ;;  %v579_v17 = vld [vmem:[#allocation6 + $0x50] sm:$0xf] }
  0x1a   :  { %252 = vmatpush.bf16.msra.mxu1 %v596_v5  ;;  %v592_v16 = vor.u32 %v710_v11, %v589_v12  ;;  %v709_v18 = vld [vmem:[#allocation6 + $0x54] sm:$0xf0]  ;;  %v109_v19 = vld [vmem:[#allocation2] sm:$0xff]  ;;  %v708_v20 = vld [vmem:[#allocation6 + $0x54] sm:$0xf]  ;;  %vm127_vm1 = vcmask 162816  }
  0x1b   :  { %v133_v14 = vsel %vm131_vm0, %v125_v9, 0  ;;  %265 = vmatpush.bf16.msra.mxu2 %v600_v10  ;;  %v581_v21 = vld [vmem:[#allocation6 + $0x58] sm:$0xf0]  ;;  %v580_v22 = vor.u32 %v709_v18, %v579_v17  ;;  %v571_v23 = vld [vmem:[#allocation6 + $0x40] sm:$0xf]  ;;  %v110_v24 = vpack.c.bf16 %v109_v19, %v109_v19  ;;  %v720_v57 = vld [vmem:[#allocation7 + $0x30] sm:$0xff] }
  0x1c   :  { %141 = vmatpush.bf16.msra.mxu0 %v133_v14  ;;  %v584_v25 = vor.u32 %v708_v20, %v581_v21  ;;  %v707_v26 = vld [vmem:[#allocation6 + $0x44] sm:$0xf0]  ;;  %v706_v27 = vld [vmem:[#allocation6 + $0x44] sm:$0xf]  ;;  %v573_v28 = vld [vmem:[#allocation6 + $0x48] sm:$0xf0] }
  0x1d   :  { %v572_v29 = vor.u32 %v707_v26, %v571_v23  ;;  %v576_v30 = vor.u32 %v706_v27, %v573_v28  ;;  %v563_v31 = vld [vmem:[#allocation6 + $0x30] sm:$0xf]  ;;  %v705_v32 = vld [vmem:[#allocation6 + $0x34] sm:$0xf0]  ;;  %v704_v33 = vld [vmem:[#allocation6 + $0x34] sm:$0xf] }
  0x1e   :  { %253 = vmatpush.bf16.msra.mxu1 %v588_v13  ;;  %v565_v34 = vld [vmem:[#allocation6 + $0x38] sm:$0xf0]  ;;  %v564_v35 = vor.u32 %v705_v32, %v563_v31  ;;  %v555_v37 = vld [vmem:[#allocation6 + $0x20] sm:$0xf]  ;;  %v703_v38 = vld [vmem:[#allocation6 + $0x24] sm:$0xf0] }
  0x1f   :  { %266 = vmatpush.bf16.msra.mxu2 %v592_v16  ;;  %v568_v36 = vor.u32 %v704_v33, %v565_v34  ;;  %v702_v39 = vld [vmem:[#allocation6 + $0x24] sm:$0xf]  ;;  %v557_v40 = vld [vmem:[#allocation6 + $0x28] sm:$0xf0]  ;;  %v556_v41 = vor.u32 %v703_v38, %v555_v37  ;;  %v547_v43 = vld [vmem:[#allocation6 + $0x10] sm:$0xf] }
  0x20   :  { %142 = vmatpush.bf16.msra.mxu0 %v697_v15  ;;  %v560_v42 = vor.u32 %v702_v39, %v557_v40  ;;  %v701_v44 = vld [vmem:[#allocation6 + $0x14] sm:$0xf0]  ;;  %v700_v45 = vld [vmem:[#allocation6 + $0x14] sm:$0xf]  ;;  %v549_v47 = vld [vmem:[#allocation6 + $0x18] sm:$0xf0] }
  0x21   :  { %v548_v46 = vor.u32 %v701_v44, %v547_v43  ;;  %v552_v48 = vor.u32 %v700_v45, %v549_v47  ;;  %v539_v49 = vld [vmem:[#allocation6] sm:$0xf]  ;;  %v699_v50 = vld [vmem:[#allocation6 + $0x4] sm:$0xf0]  ;;  %v698_v51 = vld [vmem:[#allocation6 + $0x4] sm:$0xf] }
  0x22   :  { %254 = vmatpush.bf16.msra.mxu1 %v580_v22  ;;  %v540_v52 = vor.u32 %v699_v50, %v539_v49  ;;  %v541_v53 = vld [vmem:[#allocation6 + $0x8] sm:$0xf0]  ;;  %v721_v55 = vld [vmem:[#allocation7 + $0x38] sm:$0xff]  ;;  %v728_v58 = vld [vmem:[#allocation7 + $0x70] sm:$0xff]  ;;  %vm523_vm2 = vcmask 15360  }
  0x23   :  { %536 = vmatmul.msk.bf16.vlgmr.msra.gmra.mxu0 %vm127_vm1, %v110_v24  ;;  %267 = vmatpush.bf16.msra.mxu2 %v584_v25  ;;  %v544_v54 = vor.u32 %v698_v51, %v541_v53  ;;  %v729_v56 = vld [vmem:[#allocation7 + $0x78] sm:$0xff]  ;;  %v719_v59 = vld [vmem:[#allocation7 + $0x28] sm:$0xff]  ;;  %v718_v61 = vld [vmem:[#allocation7 + $0x20] sm:$0xff] }
  0x24   :  { %414 = vmatpush.bf16.msra.mxu3 %v721_v55  ;;  %427 = vmatpush.bf16.msrb.mxu0 %v729_v56  ;;  %v727_v60 = vld [vmem:[#allocation7 + $0x68] sm:$0xff]  ;;  %v726_v62 = vld [vmem:[#allocation7 + $0x60] sm:$0xff]  ;;  %v717_v63 = vld [vmem:[#allocation7 + $0x18] sm:$0xff] }
  0x25   :  { %v725_v0 = vld [vmem:[#allocation7 + $0x58] sm:$0xff]  ;;  %v716_v1 = vld [vmem:[#allocation7 + $0x10] sm:$0xff]  ;;  %v747_v2 = vld [vmem:[%s976_s2] ss:$0 sm:$0xff] }
  0x26   :  { %255 = vmatpush.bf16.msra.mxu1 %v572_v29  ;;  %v715_v8 = vld [vmem:[#allocation7 + $0x8] sm:$0xff]  ;;  %v724_v9 = vld [vmem:[#allocation7 + $0x50] sm:$0xff]  ;;  %v714_v10 = vld [vmem:[#allocation7] sm:$0xff] }
  0x27   :  { %268 = vmatpush.bf16.msra.mxu2 %v576_v30  ;;  %v723_v11 = vld [vmem:[#allocation7 + $0x48] sm:$0xff]  ;;  %v722_v12 = vld [vmem:[#allocation7 + $0x40] sm:$0xff]  ;;  %v737_v13 = vld [vmem:[#allocation9 + $0x38] sm:$0xff] }
  0x28   :  { %415 = vmatpush.bf16.msra.mxu3 %v720_v57  ;;  %428 = vmatpush.bf16.msrb.mxu0 %v728_v58  ;;  %v736_v14 = vld [vmem:[#allocation9 + $0x30] sm:$0xff]  ;;  %v735_v15 = vld [vmem:[#allocation9 + $0x28] sm:$0xff]  ;;  %v734_v16 = vld [vmem:[#allocation9 + $0x20] sm:$0xff] }
  0x29   :  { %v166_v17 = vld [vmem:[%s978_s4] sm:$0x3]  ;;  %v733_v18 = vld [vmem:[#allocation9 + $0x18] sm:$0xff]  ;;  %v732_v21 = vld [vmem:[#allocation9 + $0x10] sm:$0xff] }
  0x2a   :  { %256 = vmatpush.bf16.msra.mxu1 %v564_v35  ;;  %v168_v19 = vperm.slane %v166_v17, 0  ;;  %v169_v24 = vperm.slane %v166_v17, 1  ;;  %v731_v32 = vld [vmem:[#allocation9 + $0x8] sm:$0xff]  ;;  %v730_v33 = vld [vmem:[#allocation9] sm:$0xff] }
  0x2b   :  { %269 = vmatpush.bf16.msra.mxu2 %v568_v36  ;;  %v748_v34 = vld [vmem:[%s980_s6] ss:$0 sm:$0xff] }
  0x2c   :  { %416 = vmatpush.bf16.msra.mxu3 %v719_v59  ;;  %429 = vmatpush.bf16.msrb.mxu0 %v727_v60  ;;  %v749_v43 = vld [vmem:[%s982_s8] ss:$0 sm:$0xff] }
  0x2e   :  { %257 = vmatpush.bf16.msra.mxu1 %v556_v41 }
  0x2f   :  { %270 = vmatpush.bf16.msra.mxu2 %v560_v42 }
  0x30   :  { %417 = vmatpush.bf16.msra.mxu3 %v718_v61  ;;  %430 = vmatpush.bf16.msrb.mxu0 %v726_v62 }
  0x32   :  { %258 = vmatpush.bf16.msra.mxu1 %v548_v46 }
  0x33   :  { %271 = vmatpush.bf16.msra.mxu2 %v552_v48 }
  0x34   :  { %418 = vmatpush.bf16.msra.mxu3 %v717_v63  ;;  %431 = vmatpush.bf16.msrb.mxu0 %v725_v0 }
  0x36   :  { %259 = vmatpush.bf16.msra.mxu1 %v540_v52 }
  0x37   :  { %272 = vmatpush.bf16.msra.mxu2 %v544_v54 }
  0x38   :  { %419 = vmatpush.bf16.msra.mxu3 %v716_v1  ;;  %432 = vmatpush.bf16.msrb.mxu0 %v724_v9 }
  0x3a   :  { %510 = vmatpush.bf16.msrb.mxu1 %v737_v13 }
  0x3c   :  { %420 = vmatpush.bf16.msra.mxu3 %v715_v8  ;;  %433 = vmatpush.bf16.msrb.mxu0 %v723_v11 }
  0x3e   :  { %511 = vmatpush.bf16.msrb.mxu1 %v736_v14 }
  0x40   :  { %421 = vmatpush.bf16.msra.mxu3 %v714_v10  ;;  %434 = vmatpush.bf16.msrb.mxu0 %v722_v12 }
  0x42   :  { %512 = vmatpush.bf16.msrb.mxu1 %v735_v15 }
  0x46   :  { %513 = vmatpush.bf16.msrb.mxu1 %v734_v16 }
  0x4a   :  { %514 = vmatpush.bf16.msrb.mxu1 %v733_v18 }
  0x4e   :  { %515 = vmatpush.bf16.msrb.mxu1 %v732_v21 }
  0x52   :  { %516 = vmatpush.bf16.msrb.mxu1 %v731_v32 }
  0x56   :  { %517 = vmatpush.bf16.msrb.mxu1 %v730_v33 }
  0xa0   :  { %v144_v3 = vpop.f32.mrf.mxu0 }
  0xa1   :  { %v145_v4 = vadd.f32 %v747_v2, %v144_v3 }
  0xa3   :  { %v148_v5 = vmax.f32 %v145_v4, 0.0 }
  0xa5   :  { %v149_v6 = vpack.c.bf16 %v148_v5, %v148_v5 }
  0xa7   :  { %260 = vmatmul.bf16.vlgmr.msra.gmra.mxu1 %v149_v6  ;;  %273 = vmatmul.bf16.vlgmr.msra.gmra.mxu2 %v149_v6 }
  0xa8   :  { %v146_v7 = vpop.f32.mrf.mxu0 }
 0x124   :  { %v261_v20 = vpop.f32.mrf.mxu1 }
 0x125   :  { %v262_v22 = vadd.f32 %v261_v20, %v168_v19 }
 0x127   :  { %v278_v23 = vmax.f32 %v262_v22, 0.0 }
 0x129   :  { %v280_v25 = vpack.c.bf16 %v278_v23, %v278_v23 }
 0x12a   :  { %v274_v26 = vpop.f32.mrf.mxu2 }
 0x12b   :  { %v275_v27 = vadd.f32 %v274_v26, %v169_v24  ;;  %422 = vmatmul.bf16.vlgmr.msra.gmra.mxu3 %v280_v25 }
 0x12c   :  { %v263_v28 = vpop.f32.mrf.mxu1 }
 0x12d   :  { %v279_v29 = vmax.f32 %v275_v27, 0.0 }
 0x12f   :  { %v281_v30 = vpack.c.bf16 %v279_v29, %v279_v29 }
 0x131   :  { %435 = vmatmul.bf16.vlgmr.msrb.gmra.mxu0 %v281_v30 }
 0x132   :  { %v276_v31 = vpop.f32.mrf.mxu2 }
 0x1ae   :  { %v423_v35 = vpop.f32.mrf.mxu3  ;;  %v436_v36 = vpop.f32.mrf.mxu0 }
 0x1af   :  { %v424_v37 = vadd.f32 %v748_v34, %v423_v35 }
 0x1b1   :  { %v437_v38 = vadd.f32 %v436_v36, %v424_v37 }
 0x1b3   :  { %v440_v39 = vmax.f32 %v437_v38, 0.0 }
 0x1b5   :  { %v441_v40 = vpack.c.bf16 %v440_v39, %v440_v39 }
 0x1b6   :  { %v425_v41 = vpop.f32.mrf.mxu3  ;;  %v438_v42 = vpop.f32.mrf.mxu0 }
 0x1b7   :  { %518 = vmatmul.bf16.vlgmr.msrb.gmra.mxu1 %v441_v40 }
 0x234   :  { %v519_v44 = vpop.f32.mrf.mxu1 }
 0x235   :  { %v520_v45 = vadd.f32 %v749_v43, %v519_v44 }
 0x237   :  { %524 = vst.msk [vmem:[%s983_s9] sm:$0xff] %vm523_vm2, %v520_v45 }
 0x23c   :  { %v521_v46 = vpop.f32.mrf.mxu1 }
 0x23d   :  { %529 = vsyncpa [#allocation3], 1 }
 0x23e   :  { %530 = vsyncpa [#allocation5], 1 }
 0x23f   :  { %531 = vsyncpa [#allocation8], 1 }

</bundles_post_ra>
